<compile_context>
chip_gen: v5e
topology: v5e:2x2
jax: 0.10.0
libtpu: 0.0.40
codegen_flags: <defaults>
</compile_context>

<pallas_src>
import jax
import jax.numpy as jnp
from jax.experimental import pallas as pl
from jax.experimental.pallas import tpu as pltpu

_SUBLANE = 8


def _round_up(a, m):
    return ((a + m - 1) // m) * m


def _fused_kernel(x_ref, o_ref):
    # x_ref: (rt, F) f32 ; o_ref: (rt, 2F) f32
    f = x_ref.shape[1]
    t = jnp.tanh(jnp.maximum(x_ref[...], 0.0) + 1.0)
    # torch.cat((y+1, y+1), dim=1).tanh(): same value in both halves.
    # Two contiguous half-row stores; lane-aligned/full-tile when F % 128 == 0.
    o_ref[:, :f] = t
    o_ref[:, f:] = t


def _choose_row_tile(b, f):
    # Double-buffered per-step footprint ~= 2 * (4B in + 8B out) * rt * F
    # = 24 * rt * F bytes.  rt*F <= 512K f32 elems keeps that ~12 MiB, inside
    # v5e's 16 MiB default scoped VMEM (plenty of headroom on v6e/v7x).
    # TODO(synk): for very wide F (budget collapsing to 8 rows) add a second
    # grid axis over 128-multiple lane tiles instead of shrinking rows.
    budget = max(_SUBLANE, (512 * 1024 // max(f, 1)) // _SUBLANE * _SUBLANE)
    if b <= 2 * _SUBLANE:
        return b  # tiny batch: single full-extent block
    # >=2 grid steps (v7x megacore split), balanced across steps.
    steps = max(2, -(-b // budget))
    return min(b, _round_up(-(-b // steps), _SUBLANE))


def model_forward_pallas(x):
    """x: (B, d1, d2) float32 -> (B, 2*d1*d2) float32 (matches torch Model)."""
    b = x.shape[0]
    x2d = x.reshape(b, -1)          # x.view(x.shape[0], -1): free (contiguous)
    f = x2d.shape[1]

    rt = _choose_row_tile(b, f)
    grid = (-(-b // rt),)           # cdiv; last block may be partial (no pad)

    return pl.pallas_call(
        _fused_kernel,
        out_shape=jax.ShapeDtypeStruct((b, 2 * f), x2d.dtype),
        grid=grid,
        in_specs=[pl.BlockSpec((rt, f), lambda i: (i, 0))],
        out_specs=pl.BlockSpec((rt, 2 * f), lambda i: (i, 0)),
        compiler_params=pltpu.CompilerParams(
            dimension_semantics=("parallel",)),
    )(x2d)


def model_forward_ref(x):
    b = x.shape[0]
    y = jnp.maximum(x.reshape(b, -1), 0.0)
    z = jnp.concatenate([y + 1.0, y + 1.0], axis=1)
    return jnp.tanh(z)


if __name__ == "__main__":
    key = jax.random.PRNGKey(0)
    x = jax.random.normal(key, (2, 2, 2), dtype=jnp.float32)

    out = model_forward_pallas(x)
    jax.block_until_ready(out)

    ref = model_forward_ref(x)
    assert out.shape == (2, 8), out.shape
    assert jnp.allclose(out, ref, atol=1e-6, rtol=1e-6), "pallas mismatch vs reference"

    # Larger, tiled/pipelined case (F=384 is a multiple of 128 -> lane-dense
    # full-tile stores, 2 balanced grid steps, no padding anywhere).
    xb = jax.random.normal(jax.random.PRNGKey(1), (2048, 16, 24), dtype=jnp.float32)
    out_b = model_forward_pallas(xb)
    jax.block_until_ready(out_b)
    ref_b = model_forward_ref(xb)
    assert out_b.shape == (2048, 2 * 16 * 24), out_b.shape
    assert jnp.allclose(out_b, ref_b, atol=1e-6, rtol=1e-6), "large-shape mismatch"

    # Uneven-batch case to exercise the partial edge block (no input pad).
    xc = jax.random.normal(jax.random.PRNGKey(2), (1000, 16, 24), dtype=jnp.float32)
    out_c = model_forward_pallas(xc)
    jax.block_until_ready(out_c)
    assert jnp.allclose(out_c, model_forward_ref(xc), atol=1e-6, rtol=1e-6), \
        "partial-block mismatch"

    print("KERNEL_OK")
</pallas_src>

<mosaic_0001>
module attributes {stable_mosaic.version = 11 : i64} {
  func.func @_fused_kernel(%arg0: i32, %arg1: memref<2x4xf32, #tpu.memory_space<vmem>>, %arg2: memref<2x8xf32, #tpu.memory_space<vmem>>) attributes {dimension_semantics = [#tpu.dimension_semantics<parallel>], iteration_bounds = array<i64: 1>, scalar_prefetch = 0 : i64, scratch_operands = 0 : i64, tpu.core_type = #tpu.core_type<tc>, window_params = [{transform_indices = @transform_0, window_bounds = array<i64: 2, 4>}, {transform_indices = @transform_1, window_bounds = array<i64: 2, 8>}]} {
    %c0 = arith.constant 0 : index
    %c0_0 = arith.constant 0 : index
    %0 = vector.load %arg1[%c0, %c0_0] : memref<2x4xf32, #tpu.memory_space<vmem>>, vector<2x4xf32>
    %cst = arith.constant 0.000000e+00 : f32
    %1 = vector.broadcast %cst : f32 to vector<2x4xf32>
    %2 = arith.maximumf %0, %1 : vector<2x4xf32>
    %cst_1 = arith.constant 1.000000e+00 : f32
    %3 = vector.broadcast %cst_1 : f32 to vector<2x4xf32>
    %4 = arith.addf %2, %3 : vector<2x4xf32>
    %5 = math.tanh %4 : vector<2x4xf32>
    %c0_2 = arith.constant 0 : index
    %c0_3 = arith.constant 0 : index
    %6 = vector.load %arg2[%c0_2, %c0_3] : memref<2x8xf32, #tpu.memory_space<vmem>>, vector<2x4xf32>
    tpu.vector_store %arg2[%c0_2, %c0_3], %5 {strides = array<i32>} : memref<2x8xf32, #tpu.memory_space<vmem>>, vector<2x4xf32>,
    %c0_4 = arith.constant 0 : index
    %c4 = arith.constant 4 : index
    %7 = vector.load %arg2[%c0_4, %c4] : memref<2x8xf32, #tpu.memory_space<vmem>>, vector<2x4xf32>
    tpu.vector_store %arg2[%c0_4, %c4], %5 {strides = array<i32>} : memref<2x8xf32, #tpu.memory_space<vmem>>, vector<2x4xf32>,
    return
  }
  func.func @transform_0(%arg0: i32) -> (i32, i32) {
    %c0_i32 = arith.constant 0 : i32
    %c0_i32_0 = arith.constant 0 : i32
    return %arg0, %c0_i32 : i32, i32
  }
  func.func @transform_1(%arg0: i32) -> (i32, i32) {
    %c0_i32 = arith.constant 0 : i32
    %c0_i32_0 = arith.constant 0 : i32
    return %arg0, %c0_i32 : i32, i32
  }
}

</mosaic_0001>

<bundles_post_ra>
// kernel: tpu_custom_call.1
= control target key start
LH: loop header
LB: loop body
LE: loop exit
PB: predicated region body
PF: predicated region fallthrough
CT: control target
= control target key end

     0   :  { %6 = vsyncpa [#allocation3], 0  ;;  %s128_s0 = inlined_call_operand.hbm [shape: f32[2,4], index: 0, kind: input, shape index: {}]   ;;  %s129_s1 = inlined_call_operand.hbm [shape: f32[2,8], index: 1, kind: output, shape index: {}]  }
   0x1   :  { %7 = vsyncpa [#allocation4], 0  ;;  %s13_s8 = sshll.u32 %s128_s0, 4  ;;  %s109_s9 = smov [#allocation2]   ;;  %s14_s8 = int_to_ptr.hbm [resolvable:$true] %s13_s8 }
   0x2   :  { %s15_s10 = sshll.u32 %s109_s9, 4  ;;  %s16_s10 = int_to_ptr.vmem [resolvable:$true] %s15_s10 }
   0x3   :  { %18 = dma.hbm_to_vmem [thread:$0]  %s14_s8, 32, %s16_s10, [#allocation3]  }
   0x4   :  { %105 = dma.done.wait [#allocation3], 32  }
   0x5   :  { %106 = vsyncadd [#allocation3], 4294967264  ;;  %v23_v0 = vld [vmem:[#allocation2] sm:$0x3]  ;;  %vm27_vm0 = vcmask 25600   ;;  %s110_s11 = smov 4  }
   0x6   :  { %v24_v1 = vmax.f32 %v23_v0, 0.0  ;;  %s111_s12 = smov [#allocation5]   ;;  %s42_s15 = sshll.u32 %s129_s1, 4  ;;  %vm33_vm1 = vcmask 58400   ;;  %s43_s15 = int_to_ptr.hbm [resolvable:$true] %s42_s15 }
   0x7   :  { %s40_s13 = sshll.u32 %s111_s12, 4  ;;  %s41_s13 = int_to_ptr.vmem [resolvable:$true] %s40_s13 }
   0x8   :  { %v25_v2 = vadd.f32 1.0, %v24_v1 }
   0xa   :  { %55 = vtanh.f32 %v25_v2 }
  0x10   :  { %v56_v3 = vpop.eup %55 }
  0x11   :  { %28 = vst.msk [vmem:[#allocation5] sm:$0x3] %vm27_vm0, %v56_v3  ;;  %30 = vrot.lane.b32.xlu0 %v56_v3, %s110_s11 }
  0x83   :  { %v31_v4 = vpop.permute.xlu0 %30 }
  0x84   :  { %34 = vst.msk [vmem:[#allocation5] sm:$0x3] %vm33_vm1, %v31_v4 }
  0x85   :  { %45 = dma.vmem_to_hbm [thread:$0]  %s41_s13, 32, %s43_s15, [#allocation4]  }
  0x86   :  { %107 = dma.done.wait [#allocation4], 32  }
  0x87   :  { %108 = vsyncadd [#allocation4], 4294967264 }
  0x88   :  { %50 = vsyncpa [#allocation3], 1 }
  0x89   :  { %51 = vsyncpa [#allocation4], 1 }

</bundles_post_ra>
